<compile_context>
chip_gen: v7x
topology: tpu7x:2x2x1
jax: 0.10.0
libtpu: 0.0.40
codegen_flags: <defaults>
</compile_context>

<pallas_src>
import functools

import jax
import jax.numpy as jnp
from jax import lax
from jax.experimental import pallas as pl
from jax.experimental.pallas import tpu as pltpu


def _attention_kernel(x_ref, mask_ref, w_q_ref, w_k_ref, w_v_ref, w_o_ref,
                      b_out_ref, o_ref, k_cache, v_cache, acc_ref, *,
                      heads, block_q, mask_heads):
    # x_ref:    (1, L, C)        per-batch resident activation slab (queries sliced from it)
    # mask_ref: (1, mh, tq, L)   additive mask tile for this q-block (mh = heads or 1)
    # w_q_ref:  (H, C, D)        per-head query weights, softmax `scale` pre-folded
    # w_k_ref / w_v_ref: (H, C, D);  w_o_ref: (H, D, C);  b_out_ref: (1, C)
    # o_ref:    (1, tq, C)
    # k_cache / v_cache: (H, L, D) VMEM scratch — K/V projections cached for the whole batch
    # acc_ref:  (tq, C) f32 VMEM scratch — per-q-block output accumulator
    q_blk = pl.program_id(1)
    cdt = x_ref.dtype

    # ---- Per-batch K/V cache: computed only at the first q-block of each batch -------------
    @pl.when(q_blk == 0)
    def _():
        def project_kv(h, carry):
            x_kv = x_ref[0]                                                   # (L, C)
            k_cache[h] = jnp.dot(x_kv, w_k_ref[h]).astype(k_cache.dtype)      # (L, D)
            v_cache[h] = jnp.dot(x_kv, w_v_ref[h]).astype(v_cache.dtype)      # (L, D)
            return carry
        lax.fori_loop(0, heads, project_kv, 0)

    q_start = pl.multiple_of(q_blk * block_q, block_q)
    acc_ref[...] = jnp.zeros_like(acc_ref)

    def head_body(h, carry):
        x_q = x_ref[0, pl.ds(q_start, block_q), :]                            # (tq, C)
        q_h = jnp.dot(x_q, w_q_ref[h])                                        # (tq, D), scale folded
        # Scores contract head_dim of q and cached k directly (no XLU transpose).
        s = lax.dot_general(q_h, k_cache[h],
                            dimension_numbers=(((1,), (1,)), ((), ())),
                            preferred_element_type=jnp.float32)               # (tq, L) f32
        m_idx = h if mask_heads > 1 else 0
        s = s + mask_ref[0, m_idx].astype(jnp.float32)

        # Numerically-stable softmax in f32; reciprocal goes to the EUP slot (approx=True).
        s = s - jnp.max(s, axis=-1, keepdims=True)
        p = jnp.exp(s)
        p = p * pl.reciprocal(jnp.sum(p, axis=-1, keepdims=True), approx=True)
        # TODO(synk): attention dropout intentionally skipped (deterministic eval-mode forward).

        o_h = jnp.dot(p.astype(cdt), v_cache[h])                              # (tq, D)
        # Per-head output projection accumulated in f32 (no lane concat of heads).
        acc_ref[...] += jnp.dot(o_h, w_o_ref[h], preferred_element_type=jnp.float32)
        return carry

    lax.fori_loop(0, heads, head_body, 0)

    o_ref[0] = (acc_ref[...] + b_out_ref[...].astype(jnp.float32)).astype(o_ref.dtype)


def _round_up(n, m):
    return -(-n // m) * m


def _padded_tile_bytes(shape, dtype):
    """Approximate VMEM bytes for one buffered copy of a block ((sublane, lane) padded)."""
    dt = jnp.dtype(dtype)
    dims = list(shape)
    if dims:
        dims[-1] = _round_up(dims[-1], 128)
    if len(dims) >= 2:
        sub = 8 * max(1, 4 // dt.itemsize)
        dims[-2] = _round_up(dims[-2], sub)
    n = 1
    for d in dims:
        n *= max(int(d), 1)
    return n * dt.itemsize


def attention_forward(x, attn_mask, w_qkv, w_out, b_out, *, heads, head_dim,
                      block_q=128):
    """x: (B, L, C); attn_mask: (B, H, L, L) or (B, 1, L, L); w_qkv: (C, 3*H*D)
    (= PyTorch to_qkv.weight^T); w_out: (H*D, C) (= output.weight^T); b_out: (1, C)."""
    B, L, C = x.shape
    inner = heads * head_dim
    assert w_qkv.shape == (C, 3 * inner)
    assert w_out.shape == (inner, C)
    mask_heads = attn_mask.shape[1]
    assert attn_mask.shape in ((B, heads, L, L), (B, 1, L, L))
    scale = float(head_dim) ** -0.5

    # Wrapper-side layout plumbing (one-time cheap XLA transposes): per-head weights with the
    # head axis LEADING so the kernel never lane-slices a live activation, and the softmax
    # scale folded into w_q so there is no per-element scale multiply in the kernel.
    w3 = w_qkv.reshape(C, 3, heads, head_dim)
    w_q = (jnp.transpose(w3[:, 0], (1, 0, 2)) * scale).astype(w_qkv.dtype)   # (H, C, D)
    w_k = jnp.transpose(w3[:, 1], (1, 0, 2))                                 # (H, C, D)
    w_v = jnp.transpose(w3[:, 2], (1, 0, 2))                                 # (H, C, D)
    w_o = w_out.reshape(heads, head_dim, C)                                  # (H, D, C)

    # Query-block tiling: bounds per-step VMEM and gives the pipeline B * (L // tq) steps.
    tq = L if L <= block_q else block_q
    assert L % tq == 0, "sequence length must be divisible by the query block size"
    num_q = L // tq

    # VMEM budget: double-buffered streams + single-buffered weights + per-batch K/V cache.
    est = (2 * _padded_tile_bytes((1, L, C), x.dtype)
           + 2 * _padded_tile_bytes((1, mask_heads, tq, L), attn_mask.dtype)
           + 3 * _padded_tile_bytes((heads, C, head_dim), w_qkv.dtype)
           + _padded_tile_bytes((heads, head_dim, C), w_out.dtype)
           + _padded_tile_bytes((1, C), b_out.dtype)
           + 2 * _padded_tile_bytes((1, tq, C), x.dtype)
           + 2 * _padded_tile_bytes((heads, L, head_dim), x.dtype)
           + _padded_tile_bytes((tq, C), jnp.float32))
    vmem_limit = int(min(128 << 20, max(32 << 20, 2 * est)))

    kernel = functools.partial(_attention_kernel, heads=heads, block_q=tq,
                               mask_heads=mask_heads)

    def const_spec(shape, single_buffer):
        index_map = lambda b, q, _n=len(shape): (0,) * _n
        if single_buffer and hasattr(pl, "Buffered"):
            try:
                return pl.BlockSpec(shape, index_map, pipeline_mode=pl.Buffered(1))
            except (TypeError, ValueError):
                pass
        return pl.BlockSpec(shape, index_map)

    def build(single_buffer):
        return pl.pallas_call(
            kernel,
            out_shape=jax.ShapeDtypeStruct((B, L, C), x.dtype),
            grid_spec=pltpu.PrefetchScalarGridSpec(
                num_scalar_prefetch=0,
                grid=(B, num_q),
                in_specs=[
                    pl.BlockSpec((1, L, C), lambda b, q: (b, 0, 0)),          # x (per-batch slab)
                    pl.BlockSpec((1, mask_heads, tq, L),
                                 lambda b, q: (b, 0, q, 0)),                  # mask tile
                    const_spec((heads, C, head_dim), single_buffer),          # w_q (scale folded)
                    const_spec((heads, C, head_dim), single_buffer),          # w_k
                    const_spec((heads, C, head_dim), single_buffer),          # w_v
                    const_spec((heads, head_dim, C), single_buffer),          # w_o
                    const_spec((1, C), single_buffer),                        # b_out
                ],
                out_specs=pl.BlockSpec((1, tq, C), lambda b, q: (b, q, 0)),
                scratch_shapes=[
                    pltpu.VMEM((heads, L, head_dim), x.dtype),   # per-batch K cache
                    pltpu.VMEM((heads, L, head_dim), x.dtype),   # per-batch V cache
                    pltpu.VMEM((tq, C), jnp.float32),            # output accumulator
                ],
            ),
            compiler_params=pltpu.CompilerParams(
                # q axis is "arbitrary": it must stay on one core so the per-batch K/V cache
                # computed at q == 0 is seen by all later q-blocks of the same batch.
                dimension_semantics=("parallel", "arbitrary"),
                vmem_limit_bytes=vmem_limit),
        )(x, attn_mask, w_q, w_k, w_v, w_o, b_out)

    try:
        return build(single_buffer=True)
    except Exception:   # pragma: no cover — fall back if Buffered(1) is unsupported
        return build(single_buffer=False)


def attention_reference(x, attn_mask, w_qkv, w_out, b_out, *, heads, head_dim):
    """Pure-JAX reference mirroring the PyTorch forward (CPU branch, no dropout)."""
    B, L, C = x.shape
    inner = heads * head_dim
    scale = float(head_dim) ** -0.5
    qkv = jnp.einsum("blc,cd->bld", x, w_qkv)
    q, k, v = jnp.split(qkv, 3, axis=-1)

    def split_heads(t):  # b l (n d) -> b n l d
        return t.reshape(B, L, heads, head_dim).transpose(0, 2, 1, 3)

    q, k, v = map(split_heads, (q, k, v))
    attn = jnp.einsum("bnld,bnmd->bnlm", q, k) * scale + attn_mask
    attn = jax.nn.softmax(attn, axis=-1)
    o = jnp.einsum("bnlm,bnmd->bnld", attn, v)
    o = o.transpose(0, 2, 1, 3).reshape(B, L, inner)
    return jnp.einsum("bld,dc->blc", o, w_out) + b_out[0]


if __name__ == "__main__":
    B = 2
    embedding_dim, heads, head_dim = 32, 4, 8
    inner = heads * head_dim

    key = jax.random.PRNGKey(0)
    kx, km, kq, kw, kb, kx2, km2 = jax.random.split(key, 7)

    # Deterministic synthetic parameters (nn.Linear shapes, stored transposed for right-mult).
    w_qkv = 0.05 * jax.random.normal(kq, (embedding_dim, 3 * inner), dtype=jnp.float32)
    w_out = 0.05 * jax.random.normal(kw, (inner, embedding_dim), dtype=jnp.float32)
    b_out = 0.05 * jax.random.normal(kb, (1, embedding_dim), dtype=jnp.float32)

    # ---- Config 1: single q-block per batch, full (B, H, L, L) mask -------------------------
    L = 8
    x = jax.random.normal(kx, (B, L, embedding_dim), dtype=jnp.float32)
    attn_mask = 0.1 * jax.random.normal(km, (B, heads, L, L), dtype=jnp.float32)

    ref = attention_reference(x, attn_mask, w_qkv, w_out, b_out,
                              heads=heads, head_dim=head_dim)
    out = jax.block_until_ready(attention_forward(
        x, attn_mask, w_qkv, w_out, b_out, heads=heads, head_dim=head_dim))
    assert out.shape == (B, L, embedding_dim)
    assert jnp.allclose(out, ref, atol=5e-3, rtol=5e-3), "f32 mismatch vs reference"

    # bf16 operands (production dtype: MXU-rate matmuls with f32 accumulation in-kernel).
    to_bf16 = lambda t: t.astype(jnp.bfloat16)
    out_bf16 = jax.block_until_ready(attention_forward(
        to_bf16(x), to_bf16(attn_mask), to_bf16(w_qkv), to_bf16(w_out), to_bf16(b_out),
        heads=heads, head_dim=head_dim))
    assert jnp.allclose(out_bf16.astype(jnp.float32), ref, atol=5e-2, rtol=5e-2), \
        "bf16 mismatch vs reference"

    # ---- Config 2: multiple q-blocks per batch (exercises the per-batch K/V cache) with a
    #      head-broadcast (B, 1, L, L) mask ---------------------------------------------------
    L2 = 32
    x2 = jax.random.normal(kx2, (B, L2, embedding_dim), dtype=jnp.float32)
    mask2 = 0.1 * jax.random.normal(km2, (B, 1, L2, L2), dtype=jnp.float32)
    ref2 = attention_reference(x2, mask2, w_qkv, w_out, b_out,
                               heads=heads, head_dim=head_dim)
    out2 = jax.block_until_ready(attention_forward(
        x2, mask2, w_qkv, w_out, b_out, heads=heads, head_dim=head_dim, block_q=16))
    assert jnp.allclose(out2, ref2, atol=5e-3, rtol=5e-3), "multi-q-block mismatch vs reference"

    print("KERNEL_OK")
</pallas_src>

<mosaic_0001>
module attributes {stable_mosaic.version = 11 : i64} {
  func.func @_attention_kernel(%arg0: i32, %arg1: i32, %arg2: memref<1x8x32xf32, #tpu.memory_space<vmem>>, %arg3: memref<1x4x8x8xf32, #tpu.memory_space<vmem>>, %arg4: memref<4x32x8xf32, #tpu.memory_space<vmem>>, %arg5: memref<4x32x8xf32, #tpu.memory_space<vmem>>, %arg6: memref<4x32x8xf32, #tpu.memory_space<vmem>>, %arg7: memref<4x8x32xf32, #tpu.memory_space<vmem>>, %arg8: memref<1x32xf32, #tpu.memory_space<vmem>>, %arg9: memref<1x8x32xf32, #tpu.memory_space<vmem>>, %arg10: memref<4x8x8xf32, #tpu.memory_space<vmem>>, %arg11: memref<4x8x8xf32, #tpu.memory_space<vmem>>, %arg12: memref<8x32xf32, #tpu.memory_space<vmem>>) attributes {dimension_semantics = [#tpu.dimension_semantics<parallel>, #tpu.dimension_semantics<arbitrary>], iteration_bounds = array<i64: 2, 1>, scalar_prefetch = 0 : i64, scratch_operands = 3 : i64, tpu.core_type = #tpu.core_type<tc>, window_params = [{transform_indices = @transform_0, window_bounds = array<i64: 1, 8, 32>}, {transform_indices = @transform_1, window_bounds = array<i64: 1, 4, 8, 8>}, {pipeline_mode = #tpu.pipeline_mode<synchronous>, transform_indices = @transform_2, window_bounds = array<i64: 4, 32, 8>}, {pipeline_mode = #tpu.pipeline_mode<synchronous>, transform_indices = @transform_3, window_bounds = array<i64: 4, 32, 8>}, {pipeline_mode = #tpu.pipeline_mode<synchronous>, transform_indices = @transform_4, window_bounds = array<i64: 4, 32, 8>}, {pipeline_mode = #tpu.pipeline_mode<synchronous>, transform_indices = @transform_5, window_bounds = array<i64: 4, 8, 32>}, {pipeline_mode = #tpu.pipeline_mode<synchronous>, transform_indices = @transform_6, window_bounds = array<i64: 1, 32>}, {transform_indices = @transform_7, window_bounds = array<i64: 1, 8, 32>}]} {
    %c0_i32 = arith.constant 0 : i32
    %0 = arith.cmpi eq, %arg1, %c0_i32 : i32
    %1 = arith.extui %0 : i1 to i32
    %c0_i32_0 = arith.constant 0 : i32
    %2 = arith.cmpi ne, %1, %c0_i32_0 : i32
    scf.if %2 {
      %c0_i32_11 = arith.constant 0 : i32
      %c4_i32_12 = arith.constant 4 : i32
      %15 = arith.addi %c0_i32_11, %c4_i32_12 : i32
      %c1_i32_13 = arith.constant 1 : i32
      scf.for %arg13 = %c0_i32_11 to %15 step %c1_i32_13  : i32 {
        %c0_15 = arith.constant 0 : index
        %c0_16 = arith.constant 0 : index
        %c0_17 = arith.constant 0 : index
        %16 = vector.load %arg2[%c0_15, %c0_16, %c0_17] : memref<1x8x32xf32, #tpu.memory_space<vmem>>, vector<1x8x32xf32>
        %17 = vector.shape_cast %16 : vector<1x8x32xf32> to vector<8x32xf32>
        %18 = arith.index_cast %arg13 : i32 to index
        %c0_18 = arith.constant 0 : index
        %c0_19 = arith.constant 0 : index
        %19 = vector.load %arg5[%18, %c0_18, %c0_19] : memref<4x32x8xf32, #tpu.memory_space<vmem>>, vector<1x32x8xf32>
        %20 = vector.shape_cast %19 : vector<1x32x8xf32> to vector<32x8xf32>
        %cst_20 = arith.constant dense<0.000000e+00> : vector<8x8xf32>
        %21 = tpu.matmul %17, %20, %cst_20 {dimension_numbers = #tpu.dot_dimension_numbers<[1], [0], [0], [1], [0, 0, 1, 1], [], []>} : vector<8x32xf32>, vector<32x8xf32>, vector<8x8xf32> -> vector<8x8xf32>
        %22 = arith.index_cast %arg13 : i32 to index
        %c0_21 = arith.constant 0 : index
        %c0_22 = arith.constant 0 : index
        %23 = vector.load %arg10[%22, %c0_21, %c0_22] : memref<4x8x8xf32, #tpu.memory_space<vmem>>, vector<1x8x8xf32>
        %24 = vector.shape_cast %23 : vector<1x8x8xf32> to vector<8x8xf32>
        %25 = vector.shape_cast %21 : vector<8x8xf32> to vector<1x8x8xf32>
        tpu.vector_store %arg10[%22, %c0_21, %c0_22], %25 {strides = array<i32>} : memref<4x8x8xf32, #tpu.memory_space<vmem>>, vector<1x8x8xf32>,
        %26 = arith.index_cast %arg13 : i32 to index
        %c0_23 = arith.constant 0 : index
        %c0_24 = arith.constant 0 : index
        %27 = vector.load %arg6[%26, %c0_23, %c0_24] : memref<4x32x8xf32, #tpu.memory_space<vmem>>, vector<1x32x8xf32>
        %28 = vector.shape_cast %27 : vector<1x32x8xf32> to vector<32x8xf32>
        %cst_25 = arith.constant dense<0.000000e+00> : vector<8x8xf32>
        %29 = tpu.matmul %17, %28, %cst_25 {dimension_numbers = #tpu.dot_dimension_numbers<[1], [0], [0], [1], [0, 0, 1, 1], [], []>} : vector<8x32xf32>, vector<32x8xf32>, vector<8x8xf32> -> vector<8x8xf32>
        %30 = arith.index_cast %arg13 : i32 to index
        %c0_26 = arith.constant 0 : index
        %c0_27 = arith.constant 0 : index
        %31 = vector.load %arg11[%30, %c0_26, %c0_27] : memref<4x8x8xf32, #tpu.memory_space<vmem>>, vector<1x8x8xf32>
        %32 = vector.shape_cast %31 : vector<1x8x8xf32> to vector<8x8xf32>
        %33 = vector.shape_cast %29 : vector<8x8xf32> to vector<1x8x8xf32>
        tpu.vector_store %arg11[%30, %c0_26, %c0_27], %33 {strides = array<i32>} : memref<4x8x8xf32, #tpu.memory_space<vmem>>, vector<1x8x8xf32>,
      }
      %c4_i32_14 = arith.constant 4 : i32
    } else {
    }
    %c8_i32 = arith.constant 8 : i32
    %3 = arith.muli %arg1, %c8_i32 : i32
    %4 = tpu.assume_multiple %3, 8 : i32
    %cst = arith.constant 0.000000e+00 : f32
    %5 = vector.broadcast %cst : f32 to vector<8x32xf32>
    %c0 = arith.constant 0 : index
    %c0_1 = arith.constant 0 : index
    %6 = vector.load %arg12[%c0, %c0_1] : memref<8x32xf32, #tpu.memory_space<vmem>>, vector<8x32xf32>
    tpu.vector_store %arg12[%c0, %c0_1], %5 {strides = array<i32>} : memref<8x32xf32, #tpu.memory_space<vmem>>, vector<8x32xf32>,
    %c0_i32_2 = arith.constant 0 : i32
    %c4_i32 = arith.constant 4 : i32
    %7 = arith.addi %c0_i32_2, %c4_i32 : i32
    %c1_i32 = arith.constant 1 : i32
    scf.for %arg13 = %c0_i32_2 to %7 step %c1_i32  : i32 {
      %c0_11 = arith.constant 0 : index
      %15 = arith.index_cast %4 : i32 to index
      %c0_12 = arith.constant 0 : index
      %16 = vector.load %arg2[%c0_11, %15, %c0_12] : memref<1x8x32xf32, #tpu.memory_space<vmem>>, vector<1x8x32xf32>
      %17 = vector.shape_cast %16 : vector<1x8x32xf32> to vector<8x32xf32>
      %18 = arith.index_cast %arg13 : i32 to index
      %c0_13 = arith.constant 0 : index
      %c0_14 = arith.constant 0 : index
      %19 = vector.load %arg4[%18, %c0_13, %c0_14] : memref<4x32x8xf32, #tpu.memory_space<vmem>>, vector<1x32x8xf32>
      %20 = vector.shape_cast %19 : vector<1x32x8xf32> to vector<32x8xf32>
      %cst_15 = arith.constant dense<0.000000e+00> : vector<8x8xf32>
      %21 = tpu.matmul %17, %20, %cst_15 {dimension_numbers = #tpu.dot_dimension_numbers<[1], [0], [0], [1], [0, 0, 1, 1], [], []>} : vector<8x32xf32>, vector<32x8xf32>, vector<8x8xf32> -> vector<8x8xf32>
      %22 = arith.index_cast %arg13 : i32 to index
      %c0_16 = arith.constant 0 : index
      %c0_17 = arith.constant 0 : index
      %23 = vector.load %arg10[%22, %c0_16, %c0_17] : memref<4x8x8xf32, #tpu.memory_space<vmem>>, vector<1x8x8xf32>
      %24 = vector.shape_cast %23 : vector<1x8x8xf32> to vector<8x8xf32>
      %cst_18 = arith.constant dense<0.000000e+00> : vector<8x8xf32>
      %25 = tpu.matmul %21, %24, %cst_18 {dimension_numbers = #tpu.dot_dimension_numbers<[1], [1], [0], [0], [0, 0, 1, 0], [], []>} : vector<8x8xf32>, vector<8x8xf32>, vector<8x8xf32> -> vector<8x8xf32>
      %c0_19 = arith.constant 0 : index
      %26 = arith.index_cast %arg13 : i32 to index
      %c0_20 = arith.constant 0 : index
      %c0_21 = arith.constant 0 : index
      %27 = vector.load %arg3[%c0_19, %26, %c0_20, %c0_21] : memref<1x4x8x8xf32, #tpu.memory_space<vmem>>, vector<1x1x8x8xf32>
      %28 = vector.shape_cast %27 : vector<1x1x8x8xf32> to vector<8x8xf32>
      %29 = arith.addf %25, %28 : vector<8x8xf32>
      %cst_22 = arith.constant dense<0xFF800000> : vector<8xf32>
      %30 = vector.multi_reduction <maximumf>, %29, %cst_22 [1] : vector<8x8xf32> to vector<8xf32>
      %31 = vector.shape_cast %30 : vector<8xf32> to vector<8x1xf32>
      %32 = vector.broadcast %31 : vector<8x1xf32> to vector<8x8xf32>
      %33 = arith.subf %29, %32 : vector<8x8xf32>
      %34 = math.exp %33 : vector<8x8xf32>
      %cst_23 = arith.constant dense<0.000000e+00> : vector<8xf32>
      %35 = vector.multi_reduction <add>, %34, %cst_23 [1] : vector<8x8xf32> to vector<8xf32>
      %36 = vector.shape_cast %35 : vector<8xf32> to vector<8x1xf32>
      %37 = tpu.reciprocal %36 {approx = true} : vector<8x1xf32> -> vector<8x1xf32>
      %38 = vector.broadcast %37 : vector<8x1xf32> to vector<8x8xf32>
      %39 = arith.mulf %34, %38 : vector<8x8xf32>
      %40 = arith.index_cast %arg13 : i32 to index
      %c0_24 = arith.constant 0 : index
      %c0_25 = arith.constant 0 : index
      %41 = vector.load %arg11[%40, %c0_24, %c0_25] : memref<4x8x8xf32, #tpu.memory_space<vmem>>, vector<1x8x8xf32>
      %42 = vector.shape_cast %41 : vector<1x8x8xf32> to vector<8x8xf32>
      %cst_26 = arith.constant dense<0.000000e+00> : vector<8x8xf32>
      %43 = tpu.matmul %39, %42, %cst_26 {dimension_numbers = #tpu.dot_dimension_numbers<[1], [0], [0], [1], [0, 0, 1, 1], [], []>} : vector<8x8xf32>, vector<8x8xf32>, vector<8x8xf32> -> vector<8x8xf32>
      %c0_27 = arith.constant 0 : index
      %c0_28 = arith.constant 0 : index
      %44 = vector.load %arg12[%c0_27, %c0_28] : memref<8x32xf32, #tpu.memory_space<vmem>>, vector<8x32xf32>
      %45 = arith.index_cast %arg13 : i32 to index
      %c0_29 = arith.constant 0 : index
      %c0_30 = arith.constant 0 : index
      %46 = vector.load %arg7[%45, %c0_29, %c0_30] : memref<4x8x32xf32, #tpu.memory_space<vmem>>, vector<1x8x32xf32>
      %47 = vector.shape_cast %46 : vector<1x8x32xf32> to vector<8x32xf32>
      %cst_31 = arith.constant dense<0.000000e+00> : vector<8x32xf32>
      %48 = tpu.matmul %43, %47, %cst_31 {dimension_numbers = #tpu.dot_dimension_numbers<[1], [0], [0], [1], [0, 0, 1, 1], [], []>} : vector<8x8xf32>, vector<8x32xf32>, vector<8x32xf32> -> vector<8x32xf32>
      %49 = arith.addf %44, %48 : vector<8x32xf32>
      %c0_32 = arith.constant 0 : index
      %c0_33 = arith.constant 0 : index
      %50 = vector.load %arg12[%c0_32, %c0_33] : memref<8x32xf32, #tpu.memory_space<vmem>>, vector<8x32xf32>
      tpu.vector_store %arg12[%c0_32, %c0_33], %49 {strides = array<i32>} : memref<8x32xf32, #tpu.memory_space<vmem>>, vector<8x32xf32>,
    }
    %c4_i32_3 = arith.constant 4 : i32
    %c0_4 = arith.constant 0 : index
    %c0_5 = arith.constant 0 : index
    %8 = vector.load %arg12[%c0_4, %c0_5] : memref<8x32xf32, #tpu.memory_space<vmem>>, vector<8x32xf32>
    %c0_6 = arith.constant 0 : index
    %c0_7 = arith.constant 0 : index
    %9 = vector.load %arg8[%c0_6, %c0_7] : memref<1x32xf32, #tpu.memory_space<vmem>>, vector<1x32xf32>
    %10 = vector.broadcast %9 : vector<1x32xf32> to vector<8x32xf32>
    %11 = arith.addf %8, %10 : vector<8x32xf32>
    %c0_8 = arith.constant 0 : index
    %c0_9 = arith.constant 0 : index
    %c0_10 = arith.constant 0 : index
    %12 = vector.load %arg9[%c0_8, %c0_9, %c0_10] : memref<1x8x32xf32, #tpu.memory_space<vmem>>, vector<1x8x32xf32>
    %13 = vector.shape_cast %12 : vector<1x8x32xf32> to vector<8x32xf32>
    %14 = vector.shape_cast %11 : vector<8x32xf32> to vector<1x8x32xf32>
    tpu.vector_store %arg9[%c0_8, %c0_9, %c0_10], %14 {strides = array<i32>} : memref<1x8x32xf32, #tpu.memory_space<vmem>>, vector<1x8x32xf32>,
    return
  }
  func.func @transform_0(%arg0: i32, %arg1: i32) -> (i32, i32, i32) {
    %c0_i32 = arith.constant 0 : i32
    %c0_i32_0 = arith.constant 0 : i32
    %c0_i32_1 = arith.constant 0 : i32
    return %arg0, %c0_i32, %c0_i32_0 : i32, i32, i32
  }
  func.func @transform_1(%arg0: i32, %arg1: i32) -> (i32, i32, i32, i32) {
    %c0_i32 = arith.constant 0 : i32
    %c0_i32_0 = arith.constant 0 : i32
    %c0_i32_1 = arith.constant 0 : i32
    return %arg0, %c0_i32, %arg1, %c0_i32_0 : i32, i32, i32, i32
  }
  func.func @transform_2(%arg0: i32, %arg1: i32) -> (i32, i32, i32) {
    %c0_i32 = arith.constant 0 : i32
    %c0_i32_0 = arith.constant 0 : i32
    %c0_i32_1 = arith.constant 0 : i32
    %c0_i32_2 = arith.constant 0 : i32
    return %c0_i32, %c0_i32_0, %c0_i32_1 : i32, i32, i32
  }
  func.func @transform_3(%arg0: i32, %arg1: i32) -> (i32, i32, i32) {
    %c0_i32 = arith.constant 0 : i32
    %c0_i32_0 = arith.constant 0 : i32
    %c0_i32_1 = arith.constant 0 : i32
    %c0_i32_2 = arith.constant 0 : i32
    return %c0_i32, %c0_i32_0, %c0_i32_1 : i32, i32, i32
  }
  func.func @transform_4(%arg0: i32, %arg1: i32) -> (i32, i32, i32) {
    %c0_i32 = arith.constant 0 : i32
    %c0_i32_0 = arith.constant 0 : i32
    %c0_i32_1 = arith.constant 0 : i32
    %c0_i32_2 = arith.constant 0 : i32
    return %c0_i32, %c0_i32_0, %c0_i32_1 : i32, i32, i32
  }
  func.func @transform_5(%arg0: i32, %arg1: i32) -> (i32, i32, i32) {
    %c0_i32 = arith.constant 0 : i32
    %c0_i32_0 = arith.constant 0 : i32
    %c0_i32_1 = arith.constant 0 : i32
    %c0_i32_2 = arith.constant 0 : i32
    return %c0_i32, %c0_i32_0, %c0_i32_1 : i32, i32, i32
  }
  func.func @transform_6(%arg0: i32, %arg1: i32) -> (i32, i32) {
    %c0_i32 = arith.constant 0 : i32
    %c0_i32_0 = arith.constant 0 : i32
    %c0_i32_1 = arith.constant 0 : i32
    return %c0_i32, %c0_i32_0 : i32, i32
  }
  func.func @transform_7(%arg0: i32, %arg1: i32) -> (i32, i32, i32) {
    %c0_i32 = arith.constant 0 : i32
    %c0_i32_0 = arith.constant 0 : i32
    return %arg0, %arg1, %c0_i32 : i32, i32, i32
  }
}

module attributes {stable_mosaic.version = 11 : i64} {
  func.func @_attention_kernel(%arg0: i32, %arg1: i32, %arg2: memref<1x8x32xf32, #tpu.memory_space<vmem>>, %arg3: memref<1x4x8x8xf32, #tpu.memory_space<vmem>>, %arg4: memref<4x32x8xf32, #tpu.memory_space<vmem>>, %arg5: memref<4x32x8xf32, #tpu.memory_space<vmem>>, %arg6: memref<4x32x8xf32, #tpu.memory_space<vmem>>, %arg7: memref<4x8x32xf32, #tpu.memory_space<vmem>>, %arg8: memref<1x32xf32, #tpu.memory_space<vmem>>, %arg9: memref<1x8x32xf32, #tpu.memory_space<vmem>>, %arg10: memref<4x8x8xf32, #tpu.memory_space<vmem>>, %arg11: memref<4x8x8xf32, #tpu.memory_space<vmem>>, %arg12: memref<8x32xf32, #tpu.memory_space<vmem>>) attributes {dimension_semantics = [#tpu.dimension_semantics<parallel>, #tpu.dimension_semantics<arbitrary>], iteration_bounds = array<i64: 2, 1>, scalar_prefetch = 0 : i64, scratch_operands = 3 : i64, tpu.core_type = #tpu.core_type<tc>, window_params = [{transform_indices = @transform_0, window_bounds = array<i64: 1, 8, 32>}, {transform_indices = @transform_1, window_bounds = array<i64: 1, 4, 8, 8>}, {pipeline_mode = #tpu.pipeline_mode<synchronous>, transform_indices = @transform_2, window_bounds = array<i64: 4, 32, 8>}, {pipeline_mode = #tpu.pipeline_mode<synchronous>, transform_indices = @transform_3, window_bounds = array<i64: 4, 32, 8>}, {pipeline_mode = #tpu.pipeline_mode<synchronous>, transform_indices = @transform_4, window_bounds = array<i64: 4, 32, 8>}, {pipeline_mode = #tpu.pipeline_mode<synchronous>, transform_indices = @transform_5, window_bounds = array<i64: 4, 8, 32>}, {pipeline_mode = #tpu.pipeline_mode<synchronous>, transform_indices = @transform_6, window_bounds = array<i64: 1, 32>}, {transform_indices = @transform_7, window_bounds = array<i64: 1, 8, 32>}]} {
    %c0_i32 = arith.constant 0 : i32
    %0 = arith.cmpi eq, %arg1, %c0_i32 : i32
    %1 = arith.extui %0 : i1 to i32
    %c0_i32_0 = arith.constant 0 : i32
    %2 = arith.cmpi ne, %1, %c0_i32_0 : i32
    scf.if %2 {
      %c0_i32_11 = arith.constant 0 : i32
      %c4_i32_12 = arith.constant 4 : i32
      %15 = arith.addi %c0_i32_11, %c4_i32_12 : i32
      %c1_i32_13 = arith.constant 1 : i32
      scf.for %arg13 = %c0_i32_11 to %15 step %c1_i32_13  : i32 {
        %c0_15 = arith.constant 0 : index
        %c0_16 = arith.constant 0 : index
        %c0_17 = arith.constant 0 : index
        %16 = vector.load %arg2[%c0_15, %c0_16, %c0_17] : memref<1x8x32xf32, #tpu.memory_space<vmem>>, vector<1x8x32xf32>
        %17 = vector.shape_cast %16 : vector<1x8x32xf32> to vector<8x32xf32>
        %18 = arith.index_cast %arg13 : i32 to index
        %c0_18 = arith.constant 0 : index
        %c0_19 = arith.constant 0 : index
        %19 = vector.load %arg5[%18, %c0_18, %c0_19] : memref<4x32x8xf32, #tpu.memory_space<vmem>>, vector<1x32x8xf32>
        %20 = vector.shape_cast %19 : vector<1x32x8xf32> to vector<32x8xf32>
        %cst_20 = arith.constant dense<0.000000e+00> : vector<8x8xf32>
        %21 = tpu.matmul %17, %20, %cst_20 {dimension_numbers = #tpu.dot_dimension_numbers<[1], [0], [0], [1], [0, 0, 1, 1], [], []>} : vector<8x32xf32>, vector<32x8xf32>, vector<8x8xf32> -> vector<8x8xf32>
        %22 = arith.index_cast %arg13 : i32 to index
        %c0_21 = arith.constant 0 : index
        %c0_22 = arith.constant 0 : index
        %23 = vector.load %arg10[%22, %c0_21, %c0_22] : memref<4x8x8xf32, #tpu.memory_space<vmem>>, vector<1x8x8xf32>
        %24 = vector.shape_cast %23 : vector<1x8x8xf32> to vector<8x8xf32>
        %25 = vector.shape_cast %21 : vector<8x8xf32> to vector<1x8x8xf32>
        tpu.vector_store %arg10[%22, %c0_21, %c0_22], %25 {strides = array<i32>} : memref<4x8x8xf32, #tpu.memory_space<vmem>>, vector<1x8x8xf32>,
        %26 = arith.index_cast %arg13 : i32 to index
        %c0_23 = arith.constant 0 : index
        %c0_24 = arith.constant 0 : index
        %27 = vector.load %arg6[%26, %c0_23, %c0_24] : memref<4x32x8xf32, #tpu.memory_space<vmem>>, vector<1x32x8xf32>
        %28 = vector.shape_cast %27 : vector<1x32x8xf32> to vector<32x8xf32>
        %cst_25 = arith.constant dense<0.000000e+00> : vector<8x8xf32>
        %29 = tpu.matmul %17, %28, %cst_25 {dimension_numbers = #tpu.dot_dimension_numbers<[1], [0], [0], [1], [0, 0, 1, 1], [], []>} : vector<8x32xf32>, vector<32x8xf32>, vector<8x8xf32> -> vector<8x8xf32>
        %30 = arith.index_cast %arg13 : i32 to index
        %c0_26 = arith.constant 0 : index
        %c0_27 = arith.constant 0 : index
        %31 = vector.load %arg11[%30, %c0_26, %c0_27] : memref<4x8x8xf32, #tpu.memory_space<vmem>>, vector<1x8x8xf32>
        %32 = vector.shape_cast %31 : vector<1x8x8xf32> to vector<8x8xf32>
        %33 = vector.shape_cast %29 : vector<8x8xf32> to vector<1x8x8xf32>
        tpu.vector_store %arg11[%30, %c0_26, %c0_27], %33 {strides = array<i32>} : memref<4x8x8xf32, #tpu.memory_space<vmem>>, vector<1x8x8xf32>,
      }
      %c4_i32_14 = arith.constant 4 : i32
    } else {
    }
    %c8_i32 = arith.constant 8 : i32
    %3 = arith.muli %arg1, %c8_i32 : i32
    %4 = tpu.assume_multiple %3, 8 : i32
    %cst = arith.constant 0.000000e+00 : f32
    %5 = vector.broadcast %cst : f32 to vector<8x32xf32>
    %c0 = arith.constant 0 : index
    %c0_1 = arith.constant 0 : index
    %6 = vector.load %arg12[%c0, %c0_1] : memref<8x32xf32, #tpu.memory_space<vmem>>, vector<8x32xf32>
    tpu.vector_store %arg12[%c0, %c0_1], %5 {strides = array<i32>} : memref<8x32xf32, #tpu.memory_space<vmem>>, vector<8x32xf32>,
    %c0_i32_2 = arith.constant 0 : i32
    %c4_i32 = arith.constant 4 : i32
    %7 = arith.addi %c0_i32_2, %c4_i32 : i32
    %c1_i32 = arith.constant 1 : i32
    scf.for %arg13 = %c0_i32_2 to %7 step %c1_i32  : i32 {
      %c0_11 = arith.constant 0 : index
      %15 = arith.index_cast %4 : i32 to index
      %c0_12 = arith.constant 0 : index
      %16 = vector.load %arg2[%c0_11, %15, %c0_12] : memref<1x8x32xf32, #tpu.memory_space<vmem>>, vector<1x8x32xf32>
      %17 = vector.shape_cast %16 : vector<1x8x32xf32> to vector<8x32xf32>
      %18 = arith.index_cast %arg13 : i32 to index
      %c0_13 = arith.constant 0 : index
      %c0_14 = arith.constant 0 : index
      %19 = vector.load %arg4[%18, %c0_13, %c0_14] : memref<4x32x8xf32, #tpu.memory_space<vmem>>, vector<1x32x8xf32>
      %20 = vector.shape_cast %19 : vector<1x32x8xf32> to vector<32x8xf32>
      %cst_15 = arith.constant dense<0.000000e+00> : vector<8x8xf32>
      %21 = tpu.matmul %17, %20, %cst_15 {dimension_numbers = #tpu.dot_dimension_numbers<[1], [0], [0], [1], [0, 0, 1, 1], [], []>} : vector<8x32xf32>, vector<32x8xf32>, vector<8x8xf32> -> vector<8x8xf32>
      %22 = arith.index_cast %arg13 : i32 to index
      %c0_16 = arith.constant 0 : index
      %c0_17 = arith.constant 0 : index
      %23 = vector.load %arg10[%22, %c0_16, %c0_17] : memref<4x8x8xf32, #tpu.memory_space<vmem>>, vector<1x8x8xf32>
      %24 = vector.shape_cast %23 : vector<1x8x8xf32> to vector<8x8xf32>
      %cst_18 = arith.constant dense<0.000000e+00> : vector<8x8xf32>
      %25 = tpu.matmul %21, %24, %cst_18 {dimension_numbers = #tpu.dot_dimension_numbers<[1], [1], [0], [0], [0, 0, 1, 0], [], []>} : vector<8x8xf32>, vector<8x8xf32>, vector<8x8xf32> -> vector<8x8xf32>
      %c0_19 = arith.constant 0 : index
      %26 = arith.index_cast %arg13 : i32 to index
      %c0_20 = arith.constant 0 : index
      %c0_21 = arith.constant 0 : index
      %27 = vector.load %arg3[%c0_19, %26, %c0_20, %c0_21] : memref<1x4x8x8xf32, #tpu.memory_space<vmem>>, vector<1x1x8x8xf32>
      %28 = vector.shape_cast %27 : vector<1x1x8x8xf32> to vector<8x8xf32>
      %29 = arith.addf %25, %28 : vector<8x8xf32>
      %cst_22 = arith.constant dense<0xFF800000> : vector<8xf32>
      %30 = vector.multi_reduction <maximumf>, %29, %cst_22 [1] : vector<8x8xf32> to vector<8xf32>
      %31 = vector.shape_cast %30 : vector<8xf32> to vector<8x1xf32>
      %32 = vector.broadcast %31 : vector<8x1xf32> to vector<8x8xf32>
      %33 = arith.subf %29, %32 : vector<8x8xf32>
      %34 = math.exp %33 : vector<8x8xf32>
      %cst_23 = arith.constant dense<0.000000e+00> : vector<8xf32>
      %35 = vector.multi_reduction <add>, %34, %cst_23 [1] : vector<8x8xf32> to vector<8xf32>
      %36 = vector.shape_cast %35 : vector<8xf32> to vector<8x1xf32>
      %37 = tpu.reciprocal %36 {approx = true} : vector<8x1xf32> -> vector<8x1xf32>
      %38 = vector.broadcast %37 : vector<8x1xf32> to vector<8x8xf32>
      %39 = arith.mulf %34, %38 : vector<8x8xf32>
      %40 = arith.index_cast %arg13 : i32 to index
      %c0_24 = arith.constant 0 : index
      %c0_25 = arith.constant 0 : index
      %41 = vector.load %arg11[%40, %c0_24, %c0_25] : memref<4x8x8xf32, #tpu.memory_space<vmem>>, vector<1x8x8xf32>
      %42 = vector.shape_cast %41 : vector<1x8x8xf32> to vector<8x8xf32>
      %cst_26 = arith.constant dense<0.000000e+00> : vector<8x8xf32>
      %43 = tpu.matmul %39, %42, %cst_26 {dimension_numbers = #tpu.dot_dimension_numbers<[1], [0], [0], [1], [0, 0, 1, 1], [], []>} : vector<8x8xf32>, vector<8x8xf32>, vector<8x8xf32> -> vector<8x8xf32>
      %c0_27 = arith.constant 0 : index
      %c0_28 = arith.constant 0 : index
      %44 = vector.load %arg12[%c0_27, %c0_28] : memref<8x32xf32, #tpu.memory_space<vmem>>, vector<8x32xf32>
      %45 = arith.index_cast %arg13 : i32 to index
      %c0_29 = arith.constant 0 : index
      %c0_30 = arith.constant 0 : index
      %46 = vector.load %arg7[%45, %c0_29, %c0_30] : memref<4x8x32xf32, #tpu.memory_space<vmem>>, vector<1x8x32xf32>
      %47 = vector.shape_cast %46 : vector<1x8x32xf32> to vector<8x32xf32>
      %cst_31 = arith.constant dense<0.000000e+00> : vector<8x32xf32>
      %48 = tpu.matmul %43, %47, %cst_31 {dimension_numbers = #tpu.dot_dimension_numbers<[1], [0], [0], [1], [0, 0, 1, 1], [], []>} : vector<8x8xf32>, vector<8x32xf32>, vector<8x32xf32> -> vector<8x32xf32>
      %49 = arith.addf %44, %48 : vector<8x32xf32>
      %c0_32 = arith.constant 0 : index
      %c0_33 = arith.constant 0 : index
      %50 = vector.load %arg12[%c0_32, %c0_33] : memref<8x32xf32, #tpu.memory_space<vmem>>, vector<8x32xf32>
      tpu.vector_store %arg12[%c0_32, %c0_33], %49 {strides = array<i32>} : memref<8x32xf32, #tpu.memory_space<vmem>>, vector<8x32xf32>,
    }
    %c4_i32_3 = arith.constant 4 : i32
    %c0_4 = arith.constant 0 : index
    %c0_5 = arith.constant 0 : index
    %8 = vector.load %arg12[%c0_4, %c0_5] : memref<8x32xf32, #tpu.memory_space<vmem>>, vector<8x32xf32>
    %c0_6 = arith.constant 0 : index
    %c0_7 = arith.constant 0 : index
    %9 = vector.load %arg8[%c0_6, %c0_7] : memref<1x32xf32, #tpu.memory_space<vmem>>, vector<1x32xf32>
    %10 = vector.broadcast %9 : vector<1x32xf32> to vector<8x32xf32>
    %11 = arith.addf %8, %10 : vector<8x32xf32>
    %c0_8 = arith.constant 0 : index
    %c0_9 = arith.constant 0 : index
    %c0_10 = arith.constant 0 : index
    %12 = vector.load %arg9[%c0_8, %c0_9, %c0_10] : memref<1x8x32xf32, #tpu.memory_space<vmem>>, vector<1x8x32xf32>
    %13 = vector.shape_cast %12 : vector<1x8x32xf32> to vector<8x32xf32>
    %14 = vector.shape_cast %11 : vector<8x32xf32> to vector<1x8x32xf32>
    tpu.vector_store %arg9[%c0_8, %c0_9, %c0_10], %14 {strides = array<i32>} : memref<1x8x32xf32, #tpu.memory_space<vmem>>, vector<1x8x32xf32>,
    return
  }
  func.func @transform_0(%arg0: i32, %arg1: i32) -> (i32, i32, i32) {
    %c0_i32 = arith.constant 0 : i32
    %c0_i32_0 = arith.constant 0 : i32
    %c0_i32_1 = arith.constant 0 : i32
    return %arg0, %c0_i32, %c0_i32_0 : i32, i32, i32
  }
  func.func @transform_1(%arg0: i32, %arg1: i32) -> (i32, i32, i32, i32) {
    %c0_i32 = arith.constant 0 : i32
    %c0_i32_0 = arith.constant 0 : i32
    %c0_i32_1 = arith.constant 0 : i32
    return %arg0, %c0_i32, %arg1, %c0_i32_0 : i32, i32, i32, i32
  }
  func.func @transform_2(%arg0: i32, %arg1: i32) -> (i32, i32, i32) {
    %c0_i32 = arith.constant 0 : i32
    %c0_i32_0 = arith.constant 0 : i32
    %c0_i32_1 = arith.constant 0 : i32
    %c0_i32_2 = arith.constant 0 : i32
    return %c0_i32, %c0_i32_0, %c0_i32_1 : i32, i32, i32
  }
  func.func @transform_3(%arg0: i32, %arg1: i32) -> (i32, i32, i32) {
    %c0_i32 = arith.constant 0 : i32
    %c0_i32_0 = arith.constant 0 : i32
    %c0_i32_1 = arith.constant 0 : i32
    %c0_i32_2 = arith.constant 0 : i32
    return %c0_i32, %c0_i32_0, %c0_i32_1 : i32, i32, i32
  }
  func.func @transform_4(%arg0: i32, %arg1: i32) -> (i32, i32, i32) {
    %c0_i32 = arith.constant 0 : i32
    %c0_i32_0 = arith.constant 0 : i32
    %c0_i32_1 = arith.constant 0 : i32
    %c0_i32_2 = arith.constant 0 : i32
    return %c0_i32, %c0_i32_0, %c0_i32_1 : i32, i32, i32
  }
  func.func @transform_5(%arg0: i32, %arg1: i32) -> (i32, i32, i32) {
    %c0_i32 = arith.constant 0 : i32
    %c0_i32_0 = arith.constant 0 : i32
    %c0_i32_1 = arith.constant 0 : i32
    %c0_i32_2 = arith.constant 0 : i32
    return %c0_i32, %c0_i32_0, %c0_i32_1 : i32, i32, i32
  }
  func.func @transform_6(%arg0: i32, %arg1: i32) -> (i32, i32) {
    %c0_i32 = arith.constant 0 : i32
    %c0_i32_0 = arith.constant 0 : i32
    %c0_i32_1 = arith.constant 0 : i32
    return %c0_i32, %c0_i32_0 : i32, i32
  }
  func.func @transform_7(%arg0: i32, %arg1: i32) -> (i32, i32, i32) {
    %c0_i32 = arith.constant 0 : i32
    %c0_i32_0 = arith.constant 0 : i32
    return %arg0, %arg1, %c0_i32 : i32, i32, i32
  }
}

</mosaic_0001>

<bundles_post_ra>
// kernel: tpu_custom_call.1
= control target key start
LH: loop header
LB: loop body
LE: loop exit
PB: predicated region body
PF: predicated region fallthrough
CT: control target
= control target key end

     0   :  { %12 = vsyncpa [#allocation6], 0  ;;  %s1499_s0 = inlined_call_operand.vmem [shape: f32[2,8,32], index: 0, kind: input, shape index: {}]   ;;  %s1500_s1 = inlined_call_operand.vmem [shape: f32[2,4,8,8], index: 1, kind: input, shape index: {}]   ;;  %s1501_s2 = inlined_call_operand.vmem [shape: f32[4,32,8], index: 2, kind: input, shape index: {}]   ;;  %s1502_s3 = inlined_call_operand.vmem [shape: f32[4,32,8], index: 3, kind: input, shape index: {}]   ;;  %s1503_s4 = inlined_call_operand.vmem [shape: f32[4,32,8], index: 4, kind: input, shape index: {}]   ;;  %s1504_s5 = inlined_call_operand.vmem [shape: f32[4,8,32], index: 5, kind: input, shape index: {}]   ;;  %s1505_s6 = inlined_call_operand.vmem [shape: f32[1,32], index: 6, kind: input, shape index: {}]   ;;  %s1506_s7 = inlined_call_operand.hbm [shape: f32[2,8,32], index: 7, kind: output, shape index: {}]  }
   0x1   :  { %14 = vsyncpa [#allocation6 + $0x1], 0  ;;  %s1307_s24 = smov 0   ;;  %s1309_s25 = smov 0  }
   0x2   :  { %s1311_s26 = smov 0   ;;  %s1313_s27 = smov 0  }
   0x3   :  { %s1315_s28 = smov 0   ;;  %s1317_s29 = smov 0  }
   0x4 LB: > { %s968_s30 = sadd.s32 4294967295, %s1249_s29   ;;  %s969_s8 = sadd.s32 4294967294, %s1249_s29   ;;  %s1249_s29 = sphi %s1317_s29, %s20_s29   ;;  %s1245_s28 = sphi %s1315_s28, %s1513_s28   ;;  %s1241_s27 = sphi %s1313_s27, %s1512_s27   ;;  %s1237_s26 = sphi %s1311_s26, %s1511_s26   ;;  %s1233_s25 = sphi %s1309_s25, %s1510_s25   ;;  %s1229_s24 = sphi %s1307_s24, %s1509_s24  }
   0x5   : > { %s32_s9 = sadd.s32 1, %s1245_s28  ;;  %s200_s10 = sadd.s32 1, %s1237_s26 }
   0x6   : > { %p34_p0 = scmp.ge.s32.totalorder %s32_s9, 2  ;;  %p210_p1 = scmp.ne.s32.totalorder %s1237_s26, %s1233_s25 }
   0x7   : > { %p211_p2 = scmp.eq.s32.totalorder %s968_s30, 1  ;;  %p216_p3 = scmp.ne.s32.totalorder %s1233_s25, %s1229_s24 }
   0x8   : > { %s1515_s9 = smov (%p34_p0, %s32_s9), 0  ;;  %p217_p5 = scmp.eq.s32.totalorder %s969_s8, 1 }
   0x9   : > { %p1347_p4 = por %p211_p2, %p210_p1  ;;  %s195_s12 = ssub.s32 %s1245_s28, %s1515_s9 }
   0xa   : > { %p972_p6 = scmp.ge.s32.totalorder %s1249_s29, 1  ;;  %p198_p7 = scmp.eq.s32.totalorder %s195_s12, 0 }
   0xb   : > { %p1354_p8 = por %p217_p5, %p216_p3  ;;  %p268_p9 = scmp.lt.s32.totalorder %s1249_s29, 3 }
   0xc   : > { %s1360_s14 = scalar_select %p198_p7, %s1237_s26, %s200_s10  }
   0xd   : > { %p269_p10 = pnand %p972_p6, %p268_p9 }
   0xe   : > { %s304_s15 = sand.u32 (!%p269_p10), 1, %s1233_s25   ;;  %p307_p11 = scmp.lt.s32.totalorder (!%p269_p10), %s1241_s27, 1 }
   0xf   : > { %272 = sbr.rel (%p269_p10) target bundleno = 1454 (0x5ae), region = 48  ;;  %s1366_s16 = sshll.u32 (!%p269_p10), %s304_s15, 3 }
  0x10   : > { %s306_s10 = scalar_lea.vmem (!%p269_p10), [#allocation5], %s1366_s16  ;;  %s1380_s12 = smov (!%p269_p10), 0  }
  0x16   : > { %s308_s17 = scalar_select %p307_p11, %s1241_s27, 1 }
  0x18   : > { %s974_s18 = sshll.u32 %s308_s17, 3  ;;  %s993_s19 = sshll.u32 %s308_s17, 5 }
  0x19   : > { %s1372_s22 = scalar_lea.vmem %s1499_s0, %s974_s18  ;;  %s1377_s8 = scalar_lea.vmem %s1500_s1, %s993_s19 }
  0x1a LB: >> { %v1259_v0 = vmov 0.0|0.0   ;;  %s977_s17 = sshll.u32 %s1253_s12, 5  ;;  %vm1260_vm0 = vmmov 0   ;;  %v1261_v1 = vmov 0.0   ;;  %v329_v14 = vld [vmem:[%s1372_s22] sm:$0xff]  ;;  %vm336_vm1 = vcmask 261120   ;;  %s1253_s12 = sphi %s1380_s12, %s328_s12  }
  0x1b   : >> { %1063 = vmatprep.subr.bf16.mxu0 %v1259_v0  ;;  %1069 = vmatprep.subr.bf16.mxu1 %v1259_v0  ;;  %s331_s20 = scalar_lea.vmem %s1502_s3, %s977_s17  ;;  %s414_s30 = scalar_lea.vmem %s1503_s4, %s977_s17  ;;  %vm412_vm2 = vcmask 64512  }
  0x1c   : >> { %1023 = vmatprep.mubr.msk.f32.mxu0 %vm1260_vm0, %v1261_v1  ;;  %1034 = vmatprep.mubr.msk.f32.mxu1 %vm1260_vm0, %v1261_v1  ;;  %v332_v2 = vld [vmem:[%s331_s20] sm:$0xff]  ;;  %v333_v3 = vld [vmem:[%s331_s20 + $0x8] sm:$0xff]  ;;  %v334_v7 = vld [vmem:[%s331_s20 + $0x10] sm:$0xff]  ;;  %s979_s17 = sshll.u32 %s1253_s12, 3  ;;  %s328_s12 = sadd.s32 1, %s1253_s12  }
  0x1d   : >> { %v415_v4 = vld [vmem:[%s414_s30] sm:$0xff]  ;;  %v1064_v5 = vpack.c.bf16 %v333_v3, %v332_v2  ;;  %v416_v6 = vld [vmem:[%s414_s30 + $0x8] sm:$0xff]  ;;  %v335_v8 = vld [vmem:[%s331_s20 + $0x18] sm:$0xff]  ;;  %s411_s18 = scalar_lea.vmem [#allocation2], %s979_s17  ;;  %s489_s19 = scalar_lea.vmem [#allocation3], %s979_s17 }
  0x1e   : >> { %v1070_v9 = vpack.c.bf16 %v416_v6, %v415_v4  ;;  %v417_v10 = vld [vmem:[%s414_s30 + $0x10] sm:$0xff]  ;;  %v418_v11 = vld [vmem:[%s414_s30 + $0x18] sm:$0xff]  ;;  %v1067_v12 = vpack.c.bf16 %v335_v8, %v334_v7  ;;  %p325_p12 = scmp.ge.s32.totalorder %s328_s12, 4  }
  0x1f   : >> { %1065 = vmatpush3.bf16.msra.mxu0 %v1064_v5  ;;  %v1073_v13 = vpack.c.bf16 %v418_v11, %v417_v10  ;;  %v1262_v19 = vmov (%p325_p12), 0.0   ;;  %s1402_s20 = smov (%p325_p12), 0  }
  0x20   : >> { %1071 = vmatpush3.bf16.msra.mxu1 %v1070_v9  ;;  %1066 = vmatprep.subr.bf16.mxu0 %v1259_v0  ;;  %493 = vst.msk [vmem:[#allocation4] sm:$0xff] (%p325_p12), %vm336_vm1, %v1262_v19 }
  0x21   : >> { %1072 = vmatprep.subr.bf16.mxu1 %v1259_v0 }
  0x23   : >> { %1068 = vmatpush3.bf16.msra.mxu0 %v1067_v12 }
  0x24   : >> { %1074 = vmatpush3.bf16.msra.mxu1 %v1073_v13 }
  0x26   : >> { %1024 = vmatmul.mubr.msk.f32.vlgmr.msra.gmra.mrb[0].mxu0 %vm336_vm1, %v329_v14 }
  0x27   : >> { %1035 = vmatmul.mubr.msk.f32.vlgmr.msra.gmra.mrb[0].mxu1 %vm336_vm1, %v329_v14 }
  0xf5   : > { %327 = sbr.rel (!%p325_p12) target bundleno = 26 (0x1a), region = 114 }
  0xf9   : >> { %v406_v15 = vpop.f32.mrb[0].mxu0 }
  0xfa   : >> { %413 = vst.msk [vmem:[%s411_s18] sm:$0xff] %vm412_vm2, %v406_v15  ;;  %v485_v16 = vpop.f32.mrb[0].mxu1  ;;  %v1025_v17 = vpop.f32.mrb[1].mxu0 }
  0xfb   : >> { %490 = vst.msk [vmem:[%s489_s19] sm:$0xff] %vm412_vm2, %v485_v16  ;;  %v1036_v18 = vpop.f32.mrb[1].mxu1 }
  0xfc LB: >> { %v1263_v20 = vmov 0.0|0.0   ;;  %vm1264_vm3 = vmmov 0   ;;  %v1265_v21 = vmov 0.0   ;;  %s981_s12 = sshll.u32 %s1257_s20, 5  ;;  %s1410_s21 = sshll.u32 %s1257_s20, 3  ;;  %v501_v29 = vld [vmem:[%s1372_s22] sm:$0xff]  ;;  %s1257_s20 = sphi %s1402_s20, %s499_s20  }
  0xfd   : >> { %1075 = vmatprep.subr.bf16.mxu0 %v1263_v20  ;;  %1045 = vmatprep.mubr.msk.f32.mxu0 %vm1264_vm3, %v1265_v21  ;;  %s503_s17 = scalar_lea.vmem %s1501_s2, %s981_s12  ;;  %s582_s18 = scalar_lea.vmem [#allocation2], %s1410_s21  ;;  %v749_v49 = vld [vmem:[#allocation4] sm:$0xff] }
  0xfe   : >> { %1048 = vmatprep.subr.mxu1 %v1265_v21  ;;  %1050 = vmatprep.mubr.msk.f32.mxu1 %vm1264_vm3, %v1265_v21  ;;  %v504_v22 = vld [vmem:[%s503_s17] sm:$0xff]  ;;  %v505_v23 = vld [vmem:[%s503_s17 + $0x8] sm:$0xff]  ;;  %v506_v24 = vld [vmem:[%s503_s17 + $0x10] sm:$0xff]  ;;  %s584_s19 = scalar_lea.vmem %s1377_s8, %s1410_s21  ;;  %s674_s12 = scalar_lea.vmem [#allocation3], %s1410_s21 }
  0xff   : >> { %v1076_v25 = vpack.c.bf16 %v505_v23, %v504_v22  ;;  %v507_v26 = vld [vmem:[%s503_s17 + $0x18] sm:$0xff]  ;;  %v585_v32 = vld [vmem:[%s584_s19] sm:$0xff]  ;;  %s750_s17 = scalar_lea.vmem %s1504_s5, %s1410_s21  ;;  %s499_s20 = sadd.s32 1, %s1257_s20  }
 0x100   : >> { %v1079_v28 = vpack.c.bf16 %v507_v26, %v506_v24  ;;  %v751_v43 = vld [vmem:[%s750_s17] sm:$0xff]  ;;  %p496_p13 = scmp.ge.s32.totalorder %s499_s20, 4  }
 0x101   : >> { %v583_v27 = vld [vmem:[%s582_s18] sm:$0xff]  ;;  %1077 = vmatpush3.bf16.msra.mxu0 %v1076_v25  ;;  %s990_s19 = sshll.u32 (%p496_p13), %s1241_s27, 7  ;;  %s852_s20 = sshll.u32 (%p496_p13), %s306_s10, 4  ;;  %s1449_s20 = int_to_ptr.vmem [resolvable:$true] %s852_s20 }
 0x102   : >> { %1049 = vmatpush3.xpose.msk.msra.mxu1 %vm412_vm2, %v583_v27  ;;  %1078 = vmatprep.subr.bf16.mxu0 %v1263_v20  ;;  %v675_v42 = vld [vmem:[%s674_s12] sm:$0xff]  ;;  %s1445_s30 = scalar_lea.hbm (%p496_p13), %s1506_s7, %s990_s19  ;;  %s838_s22 = scalar_lea.sflag (%p496_p13), [#allocation6], %s304_s15 }
 0x103   : >> { %1053 = vmatprep.subr.mxu1 %v1265_v21  ;;  %v988_v54 = vld [vmem:[%s1505_s6] ss:$0 sm:$0xff] (%p496_p13)  ;;  %s1163_s8 = scalar_lea.vmem (%p496_p13), %s1449_s20, 128  ;;  %s1266_s27 = smov (%p496_p13), [#allocation5]  }
 0x104   : > { %p1164_p0 = scmp.ne.s32.totalorder (%p496_p13), %s1449_s20, %s1163_s8  ;;  %s1167_s17 = sshll.u32 (%p496_p13), %s1266_s27, 4  ;;  %s1168_s17 = int_to_ptr.vmem [resolvable:$false] %s1167_s17 }
 0x105   : >> { %1080 = vmatpush3.bf16.msra.mxu0 %v1079_v28  ;;  %s1169_s21 = scalar_lea.vmem (%p496_p13), %s1168_s17, 256  ;;  %p1170_p3 = scmp.lt.s32.totalorder (%p496_p13), %s1449_s20, %s1168_s17 }
 0x106   : >> { %1058 = vmatprep.subr.mxu0 %v1265_v21  ;;  %p1165_p1 = pnand (%p496_p13), %p1164_p0, %p1347_p4  ;;  %p1171_p5 = scmp.lt.s32.totalorder (%p496_p13), %s1169_s21, %s1163_s8 }
 0x108   : >> { %1046 = vmatmul.mubr.msk.f32.vlgmr.msra.gmra.mrb[0].mxu0 %vm336_vm1, %v501_v29  ;;  %p1166_p2 = pneg (%p496_p13), %p1165_p1  ;;  %p1172_p6 = por (%p496_p13), %p1171_p5, %p1170_p3 }
 0x109   : >> { %1060 = vmatprep.mubr.msk.f32.mxu0 %vm1264_vm3, %v1265_v21  ;;  %1059 = vmatpush3.msra.mxu0 %v751_v43 }
 0x10a   : > { %p1173_p7 = pnand (%p496_p13), %p1172_p6, %p1166_p2 }
 0x1db   : >> { %v577_v30 = vpop.f32.mrb[0].mxu0 }
 0x1dc   : >> { %v1047_v31 = vpop.f32.mrb[1].mxu0  ;;  %1051 = vmatmul.mubr.msk.f32.vlgmr.msra.gmra.mrb[0].mxu1 %vm412_vm2, %v577_v30 }
 0x1dd   : >> { %1055 = vmatprep.mubr.msk.f32.mxu1 %vm1264_vm3, %v1265_v21  ;;  %1054 = vmatpush3.msra.mxu1 %v675_v42 }
 0x2af   : >> { %v659_v33 = vpop.f32.mrb[0].mxu1 }
 0x2b0   : >> { %v660_v34 = vadd.f32 %v659_v33, %v585_v32  ;;  %v1052_v35 = vpop.f32.mrb[1].mxu1 }
 0x2b2   : >> { %v663_v36 = vsel %vm412_vm2, %v660_v34, -inf }
 0x2b3   : >> { %664 = vmax.xlane.f32.xlu0 %v663_v36 }
 0x340   : >> { %v665_v37 = vpop.xlane.xlu0 %664 }
 0x341   : >> { %v666_v38 = vsub.f32 %v660_v34, %v665_v37 }
 0x343   : >> { %v667_v39 = vmul.f32 1.442695, %v666_v38 }
 0x345   : >> { %1159 = vpow2.f32 %v667_v39 }
 0x34f   : >> { %v1160_v40 = vpop.eup %1159 }
 0x350   : >> { %v669_v41 = vsel %vm412_vm2, %v1160_v40, 0.0 }
 0x351   : >> { %670 = vadd.xlane.f32.xlu0 %v669_v41 }
 0x3de   : >> { %v671_v44 = vpop.xlane.xlu0 %670 }
 0x3df   : >> { %1161 = vrcp.f32 %v671_v44 }
 0x3e9   : >> { %v1162_v45 = vpop.eup %1161 }
 0x3ea   : >> { %v673_v46 = vmul.f32 %v1162_v45, %v1160_v40 }
 0x3ec   : >> { %1056 = vmatmul.mubr.msk.f32.vlgmr.msra.gmra.mrb[2].mxu1 %vm412_vm2, %v673_v46 }
 0x4bf   : >> { %v745_v47 = vpop.f32.mrb[2].mxu1 }
 0x4c0   : >> { %v1057_v48 = vpop.f32.mrb[3].mxu1  ;;  %1061 = vmatmul.mubr.msk.f32.vlgmr.msra.gmra.mrb[2].mxu0 %vm412_vm2, %v745_v47 }
 0x590   : > { %498 = sbr.rel (!%p496_p13) target bundleno = 252 (0xfc), region = 125 }
 0x593   : >> { %v821_v50 = vpop.f32.mrb[2].mxu0 }
 0x594   : >> { %v825_v51 = vadd.f32 %v821_v50, %v749_v49  ;;  %v1062_v52 = vpop.f32.mrb[3].mxu0 }
 0x596   : >> { %826 = vst.msk [vmem:[#allocation4] sm:$0xff] %vm336_vm1, %v825_v51 }
 0x59d   : > { %v827_v53 = vld [vmem:[#allocation4] sm:$0xff] }
 0x59e   : > { %v835_v55 = vadd.f32 %v988_v54, %v827_v53 }
 0x5a0   : > { %836 = vst.msk [vmem:[%s306_s10] sm:$0xff] %vm336_vm1, %v835_v55 }
 0x5a1   : > { %1176 = shalt.err (!%p1173_p7)
}
 0x5a2   : > { %s1177_s15 = scalar_lea.hbm %s1445_s30, 128  ;;  %s1181_s18 = scalar_lea.hbm %s1506_s7, 256 }
 0x5a3   : > { %p1178_p9 = scmp.ne.s32.totalorder %s1445_s30, %s1177_s15  ;;  %p1182_p12 = scmp.lt.u32.totalorder %s1445_s30, %s1506_s7 }
 0x5a4   : > { %p1183_p13 = scmp.lt.u32.totalorder %s1181_s18, %s1177_s15  ;;  %p1185_p1 = scmp.lt.u32.totalorder %s1177_s15, %s1445_s30 }
 0x5a5   : > { %p1179_p10 = pnand %p1178_p9, %p1347_p4 }
 0x5a6   : > { %p1184_p0 = por %p1183_p13, %p1182_p12 }
 0x5a7   : > { %p1180_p11 = pneg %p1179_p10 }
 0x5a8   : > { %p1186_p2 = por %p1185_p1, %p1184_p0 }
 0x5aa   : > { %p1187_p3 = pnand %p1186_p2, %p1180_p11 }
 0x5ac   : > { %1190 = shalt.err (!%p1187_p3)
}
 0x5ad   : > { %1081 = dma.vmem_to_hbm [thread:$0]  (%p1347_p4), %s1449_s20, 128, %s1445_s30, %s838_s22  }
 0x5ae PF: > { %p1087_p5 = scmp.ge.s32.totalorder %s1249_s29, 2  ;;  %s864_s23 = sand.u32 1, %s1229_s24  }
 0x5af   : > { %s865_s8 = scalar_lea.sflag [#allocation6], %s864_s23 }
 0x5b0   : > { %p1084_p6 = pnand %p1087_p5, %p1354_p8 }
 0x5b2   : > { %1224 = dma.done.wait (!%p1084_p6), %s865_s8, 128  }
 0x5b3   : > { %1226 = vsyncadd (!%p1084_p6), %s865_s8, 4294967168  ;;  %s20_s29 = sadd.s32 1, %s1249_s29   ;;  %s1509_s24 = smov %s1233_s25 }
 0x5b4   : > { %p17_p7 = scmp.ge.s32.totalorder %s20_s29, 4   ;;  %s1510_s25 = smov %s1237_s26 }
 0x5b5   : > { %s1511_s26 = smov %s1360_s14  ;;  %s1512_s27 = smov %s1245_s28 }
 0x5b6   : > { %s1513_s28 = smov %s1515_s9  ;;  %19 = sbr.rel (!%p17_p7) target bundleno = 4 (0x4), region = 136 }
 0x5bd   :  { %870 = vsyncpa [#allocation6], 1 }
 0x5be   :  { %872 = vsyncpa [#allocation6 + $0x1], 1 }

// kernel: tpu_custom_call.1
= control target key start
LH: loop header
LB: loop body
LE: loop exit
PB: predicated region body
PF: predicated region fallthrough
CT: control target
= control target key end

     0   :  { %12 = vsyncpa [#allocation6], 0  ;;  %s1499_s0 = inlined_call_operand.vmem [shape: f32[2,8,32], index: 0, kind: input, shape index: {}]   ;;  %s1500_s1 = inlined_call_operand.vmem [shape: f32[2,4,8,8], index: 1, kind: input, shape index: {}]   ;;  %s1501_s2 = inlined_call_operand.vmem [shape: f32[4,32,8], index: 2, kind: input, shape index: {}]   ;;  %s1502_s3 = inlined_call_operand.vmem [shape: f32[4,32,8], index: 3, kind: input, shape index: {}]   ;;  %s1503_s4 = inlined_call_operand.vmem [shape: f32[4,32,8], index: 4, kind: input, shape index: {}]   ;;  %s1504_s5 = inlined_call_operand.vmem [shape: f32[4,8,32], index: 5, kind: input, shape index: {}]   ;;  %s1505_s6 = inlined_call_operand.vmem [shape: f32[1,32], index: 6, kind: input, shape index: {}]   ;;  %s1506_s7 = inlined_call_operand.hbm [shape: f32[2,8,32], index: 7, kind: output, shape index: {}]  }
   0x1   :  { %14 = vsyncpa [#allocation6 + $0x1], 0  ;;  %s1307_s24 = smov 0   ;;  %s1309_s25 = smov 0  }
   0x2   :  { %s1311_s26 = smov 0   ;;  %s1313_s27 = smov 0  }
   0x3   :  { %s1315_s28 = smov 0   ;;  %s1317_s29 = smov 0  }
   0x4 LB: > { %s968_s30 = sadd.s32 4294967295, %s1249_s29   ;;  %s969_s8 = sadd.s32 4294967294, %s1249_s29   ;;  %s1249_s29 = sphi %s1317_s29, %s20_s29   ;;  %s1245_s28 = sphi %s1315_s28, %s1513_s28   ;;  %s1241_s27 = sphi %s1313_s27, %s1512_s27   ;;  %s1237_s26 = sphi %s1311_s26, %s1511_s26   ;;  %s1233_s25 = sphi %s1309_s25, %s1510_s25   ;;  %s1229_s24 = sphi %s1307_s24, %s1509_s24  }
   0x5   : > { %s32_s9 = sadd.s32 1, %s1245_s28  ;;  %s200_s10 = sadd.s32 1, %s1237_s26 }
   0x6   : > { %p34_p0 = scmp.ge.s32.totalorder %s32_s9, 2  ;;  %p210_p1 = scmp.ne.s32.totalorder %s1237_s26, %s1233_s25 }
   0x7   : > { %p211_p2 = scmp.eq.s32.totalorder %s968_s30, 1  ;;  %p216_p3 = scmp.ne.s32.totalorder %s1233_s25, %s1229_s24 }
   0x8   : > { %s1515_s9 = smov (%p34_p0, %s32_s9), 0  ;;  %p217_p5 = scmp.eq.s32.totalorder %s969_s8, 1 }
   0x9   : > { %p1347_p4 = por %p211_p2, %p210_p1  ;;  %s195_s12 = ssub.s32 %s1245_s28, %s1515_s9 }
   0xa   : > { %p972_p6 = scmp.ge.s32.totalorder %s1249_s29, 1  ;;  %p198_p7 = scmp.eq.s32.totalorder %s195_s12, 0 }
   0xb   : > { %p1354_p8 = por %p217_p5, %p216_p3  ;;  %p268_p9 = scmp.lt.s32.totalorder %s1249_s29, 3 }
   0xc   : > { %s1360_s14 = scalar_select %p198_p7, %s1237_s26, %s200_s10  }
   0xd   : > { %p269_p10 = pnand %p972_p6, %p268_p9 }
   0xe   : > { %s304_s15 = sand.u32 (!%p269_p10), 1, %s1233_s25   ;;  %p307_p11 = scmp.lt.s32.totalorder (!%p269_p10), %s1241_s27, 1 }
   0xf   : > { %272 = sbr.rel (%p269_p10) target bundleno = 1454 (0x5ae), region = 48  ;;  %s1366_s16 = sshll.u32 (!%p269_p10), %s304_s15, 3 }
  0x10   : > { %s306_s10 = scalar_lea.vmem (!%p269_p10), [#allocation5], %s1366_s16  ;;  %s1380_s12 = smov (!%p269_p10), 0  }
  0x16   : > { %s308_s17 = scalar_select %p307_p11, %s1241_s27, 1 }
  0x18   : > { %s974_s18 = sshll.u32 %s308_s17, 3  ;;  %s993_s19 = sshll.u32 %s308_s17, 5 }
  0x19   : > { %s1372_s22 = scalar_lea.vmem %s1499_s0, %s974_s18  ;;  %s1377_s8 = scalar_lea.vmem %s1500_s1, %s993_s19 }
  0x1a LB: >> { %v1259_v0 = vmov 0.0|0.0   ;;  %s977_s17 = sshll.u32 %s1253_s12, 5  ;;  %vm1260_vm0 = vmmov 0   ;;  %v1261_v1 = vmov 0.0   ;;  %v329_v14 = vld [vmem:[%s1372_s22] sm:$0xff]  ;;  %vm336_vm1 = vcmask 261120   ;;  %s1253_s12 = sphi %s1380_s12, %s328_s12  }
  0x1b   : >> { %1063 = vmatprep.subr.bf16.mxu0 %v1259_v0  ;;  %1069 = vmatprep.subr.bf16.mxu1 %v1259_v0  ;;  %s331_s20 = scalar_lea.vmem %s1502_s3, %s977_s17  ;;  %s414_s30 = scalar_lea.vmem %s1503_s4, %s977_s17  ;;  %vm412_vm2 = vcmask 64512  }
  0x1c   : >> { %1023 = vmatprep.mubr.msk.f32.mxu0 %vm1260_vm0, %v1261_v1  ;;  %1034 = vmatprep.mubr.msk.f32.mxu1 %vm1260_vm0, %v1261_v1  ;;  %v332_v2 = vld [vmem:[%s331_s20] sm:$0xff]  ;;  %v333_v3 = vld [vmem:[%s331_s20 + $0x8] sm:$0xff]  ;;  %v334_v7 = vld [vmem:[%s331_s20 + $0x10] sm:$0xff]  ;;  %s979_s17 = sshll.u32 %s1253_s12, 3  ;;  %s328_s12 = sadd.s32 1, %s1253_s12  }
  0x1d   : >> { %v415_v4 = vld [vmem:[%s414_s30] sm:$0xff]  ;;  %v1064_v5 = vpack.c.bf16 %v333_v3, %v332_v2  ;;  %v416_v6 = vld [vmem:[%s414_s30 + $0x8] sm:$0xff]  ;;  %v335_v8 = vld [vmem:[%s331_s20 + $0x18] sm:$0xff]  ;;  %s411_s18 = scalar_lea.vmem [#allocation2], %s979_s17  ;;  %s489_s19 = scalar_lea.vmem [#allocation3], %s979_s17 }
  0x1e   : >> { %v1070_v9 = vpack.c.bf16 %v416_v6, %v415_v4  ;;  %v417_v10 = vld [vmem:[%s414_s30 + $0x10] sm:$0xff]  ;;  %v418_v11 = vld [vmem:[%s414_s30 + $0x18] sm:$0xff]  ;;  %v1067_v12 = vpack.c.bf16 %v335_v8, %v334_v7  ;;  %p325_p12 = scmp.ge.s32.totalorder %s328_s12, 4  }
  0x1f   : >> { %1065 = vmatpush3.bf16.msra.mxu0 %v1064_v5  ;;  %v1073_v13 = vpack.c.bf16 %v418_v11, %v417_v10  ;;  %v1262_v19 = vmov (%p325_p12), 0.0   ;;  %s1402_s20 = smov (%p325_p12), 0  }
  0x20   : >> { %1071 = vmatpush3.bf16.msra.mxu1 %v1070_v9  ;;  %1066 = vmatprep.subr.bf16.mxu0 %v1259_v0  ;;  %493 = vst.msk [vmem:[#allocation4] sm:$0xff] (%p325_p12), %vm336_vm1, %v1262_v19 }
  0x21   : >> { %1072 = vmatprep.subr.bf16.mxu1 %v1259_v0 }
  0x23   : >> { %1068 = vmatpush3.bf16.msra.mxu0 %v1067_v12 }
  0x24   : >> { %1074 = vmatpush3.bf16.msra.mxu1 %v1073_v13 }
  0x26   : >> { %1024 = vmatmul.mubr.msk.f32.vlgmr.msra.gmra.mrb[0].mxu0 %vm336_vm1, %v329_v14 }
  0x27   : >> { %1035 = vmatmul.mubr.msk.f32.vlgmr.msra.gmra.mrb[0].mxu1 %vm336_vm1, %v329_v14 }
  0xf5   : > { %327 = sbr.rel (!%p325_p12) target bundleno = 26 (0x1a), region = 114 }
  0xf9   : >> { %v406_v15 = vpop.f32.mrb[0].mxu0 }
  0xfa   : >> { %413 = vst.msk [vmem:[%s411_s18] sm:$0xff] %vm412_vm2, %v406_v15  ;;  %v485_v16 = vpop.f32.mrb[0].mxu1  ;;  %v1025_v17 = vpop.f32.mrb[1].mxu0 }
  0xfb   : >> { %490 = vst.msk [vmem:[%s489_s19] sm:$0xff] %vm412_vm2, %v485_v16  ;;  %v1036_v18 = vpop.f32.mrb[1].mxu1 }
  0xfc LB: >> { %v1263_v20 = vmov 0.0|0.0   ;;  %vm1264_vm3 = vmmov 0   ;;  %v1265_v21 = vmov 0.0   ;;  %s981_s12 = sshll.u32 %s1257_s20, 5  ;;  %s1410_s21 = sshll.u32 %s1257_s20, 3  ;;  %v501_v29 = vld [vmem:[%s1372_s22] sm:$0xff]  ;;  %s1257_s20 = sphi %s1402_s20, %s499_s20  }
  0xfd   : >> { %1075 = vmatprep.subr.bf16.mxu0 %v1263_v20  ;;  %1045 = vmatprep.mubr.msk.f32.mxu0 %vm1264_vm3, %v1265_v21  ;;  %s503_s17 = scalar_lea.vmem %s1501_s2, %s981_s12  ;;  %s582_s18 = scalar_lea.vmem [#allocation2], %s1410_s21  ;;  %v749_v49 = vld [vmem:[#allocation4] sm:$0xff] }
  0xfe   : >> { %1048 = vmatprep.subr.mxu1 %v1265_v21  ;;  %1050 = vmatprep.mubr.msk.f32.mxu1 %vm1264_vm3, %v1265_v21  ;;  %v504_v22 = vld [vmem:[%s503_s17] sm:$0xff]  ;;  %v505_v23 = vld [vmem:[%s503_s17 + $0x8] sm:$0xff]  ;;  %v506_v24 = vld [vmem:[%s503_s17 + $0x10] sm:$0xff]  ;;  %s584_s19 = scalar_lea.vmem %s1377_s8, %s1410_s21  ;;  %s674_s12 = scalar_lea.vmem [#allocation3], %s1410_s21 }
  0xff   : >> { %v1076_v25 = vpack.c.bf16 %v505_v23, %v504_v22  ;;  %v507_v26 = vld [vmem:[%s503_s17 + $0x18] sm:$0xff]  ;;  %v585_v32 = vld [vmem:[%s584_s19] sm:$0xff]  ;;  %s750_s17 = scalar_lea.vmem %s1504_s5, %s1410_s21  ;;  %s499_s20 = sadd.s32 1, %s1257_s20  }
 0x100   : >> { %v1079_v28 = vpack.c.bf16 %v507_v26, %v506_v24  ;;  %v751_v43 = vld [vmem:[%s750_s17] sm:$0xff]  ;;  %p496_p13 = scmp.ge.s32.totalorder %s499_s20, 4  }
 0x101   : >> { %v583_v27 = vld [vmem:[%s582_s18] sm:$0xff]  ;;  %1077 = vmatpush3.bf16.msra.mxu0 %v1076_v25  ;;  %s990_s19 = sshll.u32 (%p496_p13), %s1241_s27, 7  ;;  %s852_s20 = sshll.u32 (%p496_p13), %s306_s10, 4  ;;  %s1449_s20 = int_to_ptr.vmem [resolvable:$true] %s852_s20 }
 0x102   : >> { %1049 = vmatpush3.xpose.msk.msra.mxu1 %vm412_vm2, %v583_v27  ;;  %1078 = vmatprep.subr.bf16.mxu0 %v1263_v20  ;;  %v675_v42 = vld [vmem:[%s674_s12] sm:$0xff]  ;;  %s1445_s30 = scalar_lea.hbm (%p496_p13), %s1506_s7, %s990_s19  ;;  %s838_s22 = scalar_lea.sflag (%p496_p13), [#allocation6], %s304_s15 }
 0x103   : >> { %1053 = vmatprep.subr.mxu1 %v1265_v21  ;;  %v988_v54 = vld [vmem:[%s1505_s6] ss:$0 sm:$0xff] (%p496_p13)  ;;  %s1163_s8 = scalar_lea.vmem (%p496_p13), %s1449_s20, 128  ;;  %s1266_s27 = smov (%p496_p13), [#allocation5]  }
 0x104   : > { %p1164_p0 = scmp.ne.s32.totalorder (%p496_p13), %s1449_s20, %s1163_s8  ;;  %s1167_s17 = sshll.u32 (%p496_p13), %s1266_s27, 4  ;;  %s1168_s17 = int_to_ptr.vmem [resolvable:$false] %s1167_s17 }
 0x105   : >> { %1080 = vmatpush3.bf16.msra.mxu0 %v1079_v28  ;;  %s1169_s21 = scalar_lea.vmem (%p496_p13), %s1168_s17, 256  ;;  %p1170_p3 = scmp.lt.s32.totalorder (%p496_p13), %s1449_s20, %s1168_s17 }
 0x106   : >> { %1058 = vmatprep.subr.mxu0 %v1265_v21  ;;  %p1165_p1 = pnand (%p496_p13), %p1164_p0, %p1347_p4  ;;  %p1171_p5 = scmp.lt.s32.totalorder (%p496_p13), %s1169_s21, %s1163_s8 }
 0x108   : >> { %1046 = vmatmul.mubr.msk.f32.vlgmr.msra.gmra.mrb[0].mxu0 %vm336_vm1, %v501_v29  ;;  %p1166_p2 = pneg (%p496_p13), %p1165_p1  ;;  %p1172_p6 = por (%p496_p13), %p1171_p5, %p1170_p3 }
 0x109   : >> { %1060 = vmatprep.mubr.msk.f32.mxu0 %vm1264_vm3, %v1265_v21  ;;  %1059 = vmatpush3.msra.mxu0 %v751_v43 }
 0x10a   : > { %p1173_p7 = pnand (%p496_p13), %p1172_p6, %p1166_p2 }
 0x1db   : >> { %v577_v30 = vpop.f32.mrb[0].mxu0 }
 0x1dc   : >> { %v1047_v31 = vpop.f32.mrb[1].mxu0  ;;  %1051 = vmatmul.mubr.msk.f32.vlgmr.msra.gmra.mrb[0].mxu1 %vm412_vm2, %v577_v30 }
 0x1dd   : >> { %1055 = vmatprep.mubr.msk.f32.mxu1 %vm1264_vm3, %v1265_v21  ;;  %1054 = vmatpush3.msra.mxu1 %v675_v42 }
 0x2af   : >> { %v659_v33 = vpop.f32.mrb[0].mxu1 }
 0x2b0   : >> { %v660_v34 = vadd.f32 %v659_v33, %v585_v32  ;;  %v1052_v35 = vpop.f32.mrb[1].mxu1 }
 0x2b2   : >> { %v663_v36 = vsel %vm412_vm2, %v660_v34, -inf }
 0x2b3   : >> { %664 = vmax.xlane.f32.xlu0 %v663_v36 }
 0x340   : >> { %v665_v37 = vpop.xlane.xlu0 %664 }
 0x341   : >> { %v666_v38 = vsub.f32 %v660_v34, %v665_v37 }
 0x343   : >> { %v667_v39 = vmul.f32 1.442695, %v666_v38 }
 0x345   : >> { %1159 = vpow2.f32 %v667_v39 }
 0x34f   : >> { %v1160_v40 = vpop.eup %1159 }
 0x350   : >> { %v669_v41 = vsel %vm412_vm2, %v1160_v40, 0.0 }
 0x351   : >> { %670 = vadd.xlane.f32.xlu0 %v669_v41 }
 0x3de   : >> { %v671_v44 = vpop.xlane.xlu0 %670 }
 0x3df   : >> { %1161 = vrcp.f32 %v671_v44 }
 0x3e9   : >> { %v1162_v45 = vpop.eup %1161 }
 0x3ea   : >> { %v673_v46 = vmul.f32 %v1162_v45, %v1160_v40 }
 0x3ec   : >> { %1056 = vmatmul.mubr.msk.f32.vlgmr.msra.gmra.mrb[2].mxu1 %vm412_vm2, %v673_v46 }
 0x4bf   : >> { %v745_v47 = vpop.f32.mrb[2].mxu1 }
 0x4c0   : >> { %v1057_v48 = vpop.f32.mrb[3].mxu1  ;;  %1061 = vmatmul.mubr.msk.f32.vlgmr.msra.gmra.mrb[2].mxu0 %vm412_vm2, %v745_v47 }
 0x590   : > { %498 = sbr.rel (!%p496_p13) target bundleno = 252 (0xfc), region = 125 }
 0x593   : >> { %v821_v50 = vpop.f32.mrb[2].mxu0 }
 0x594   : >> { %v825_v51 = vadd.f32 %v821_v50, %v749_v49  ;;  %v1062_v52 = vpop.f32.mrb[3].mxu0 }
 0x596   : >> { %826 = vst.msk [vmem:[#allocation4] sm:$0xff] %vm336_vm1, %v825_v51 }
 0x59d   : > { %v827_v53 = vld [vmem:[#allocation4] sm:$0xff] }
 0x59e   : > { %v835_v55 = vadd.f32 %v988_v54, %v827_v53 }
 0x5a0   : > { %836 = vst.msk [vmem:[%s306_s10] sm:$0xff] %vm336_vm1, %v835_v55 }
 0x5a1   : > { %1176 = shalt.err (!%p1173_p7)
}
 0x5a2   : > { %s1177_s15 = scalar_lea.hbm %s1445_s30, 128  ;;  %s1181_s18 = scalar_lea.hbm %s1506_s7, 256 }
 0x5a3   : > { %p1178_p9 = scmp.ne.s32.totalorder %s1445_s30, %s1177_s15  ;;  %p1182_p12 = scmp.lt.u32.totalorder %s1445_s30, %s1506_s7 }
 0x5a4   : > { %p1183_p13 = scmp.lt.u32.totalorder %s1181_s18, %s1177_s15  ;;  %p1185_p1 = scmp.lt.u32.totalorder %s1177_s15, %s1445_s30 }
 0x5a5   : > { %p1179_p10 = pnand %p1178_p9, %p1347_p4 }
 0x5a6   : > { %p1184_p0 = por %p1183_p13, %p1182_p12 }
 0x5a7   : > { %p1180_p11 = pneg %p1179_p10 }
 0x5a8   : > { %p1186_p2 = por %p1185_p1, %p1184_p0 }
 0x5aa   : > { %p1187_p3 = pnand %p1186_p2, %p1180_p11 }
 0x5ac   : > { %1190 = shalt.err (!%p1187_p3)
}
 0x5ad   : > { %1081 = dma.vmem_to_hbm [thread:$0]  (%p1347_p4), %s1449_s20, 128, %s1445_s30, %s838_s22  }
 0x5ae PF: > { %p1087_p5 = scmp.ge.s32.totalorder %s1249_s29, 2  ;;  %s864_s23 = sand.u32 1, %s1229_s24  }
 0x5af   : > { %s865_s8 = scalar_lea.sflag [#allocation6], %s864_s23 }
 0x5b0   : > { %p1084_p6 = pnand %p1087_p5, %p1354_p8 }
 0x5b2   : > { %1224 = dma.done.wait (!%p1084_p6), %s865_s8, 128  }
 0x5b3   : > { %1226 = vsyncadd (!%p1084_p6), %s865_s8, 4294967168  ;;  %s20_s29 = sadd.s32 1, %s1249_s29   ;;  %s1509_s24 = smov %s1233_s25 }
 0x5b4   : > { %p17_p7 = scmp.ge.s32.totalorder %s20_s29, 4   ;;  %s1510_s25 = smov %s1237_s26 }
 0x5b5   : > { %s1511_s26 = smov %s1360_s14  ;;  %s1512_s27 = smov %s1245_s28 }
 0x5b6   : > { %s1513_s28 = smov %s1515_s9  ;;  %19 = sbr.rel (!%p17_p7) target bundleno = 4 (0x4), region = 136 }
 0x5bd   :  { %870 = vsyncpa [#allocation6], 1 }
 0x5be   :  { %872 = vsyncpa [#allocation6 + $0x1], 1 }

</bundles_post_ra>
